<compile_context>
chip_gen: v6e
topology: v6e:2x2x1
jax: 0.10.0
libtpu: 0.0.40
codegen_flags: <defaults>
</compile_context>

<pallas_src>
import functools

import jax
import jax.numpy as jnp
import numpy as np
from jax.experimental import pallas as pl
from jax.experimental.pallas import tpu as pltpu


def _round_up(x, m):
    return ((x + m - 1) // m) * m


def _make_mlp_kernel(layer_dims, act_fun, bias_col):
    """Fused MLP kernel.

    Kernel refs: x_ref (d0, TB), wb_ref (L, Rpad, Cpad), o_ref (dL, TB).
    Layer l uses  W = wb_ref[l, :dout, :din]  and  b = wb_ref[l, :dout, bias_col].
    Activation applied after every layer except the last (matches the module).
    All slices below are static, so they are zero-cost ref views.
    """
    num_layers = len(layer_dims)

    def kernel(x_ref, wb_ref, o_ref):
        h = x_ref[...]  # (d0, TB) in the parameter dtype (f32 or bf16)
        for l, (din, dout) in enumerate(layer_dims):
            w = wb_ref[l, :dout, :din]                                       # (dout, din)
            b = wb_ref[l, :dout, bias_col:bias_col + 1].astype(jnp.float32)  # (dout, 1)
            # MXU matmul in the parameter dtype, f32 accumulation; bias + act on VPU/EUP.
            z = jnp.dot(w, h.astype(w.dtype),
                        preferred_element_type=jnp.float32) + b              # (dout, TB) f32
            h = act_fun(z) if l < num_layers - 1 else z
        o_ref[...] = h.astype(o_ref.dtype)

    return kernel


def pack_params(weights, biases, dtype=jnp.float32):
    """Pack per-layer (out, in) weights and (out,) biases into one padded slab.

    Returns (slab, bias_col): slab has shape (L, Rpad, Cpad); layer l's weight
    occupies [:out_l, :in_l] and its bias sits in lane column `bias_col`.
    Built with numpy so the packing is a single constant, not many XLA ops.
    """
    max_out = max(w.shape[0] for w in weights)
    max_in = max(w.shape[1] for w in weights)
    rpad = _round_up(max_out, 8)
    cpad = _round_up(max_in + 1, 128)
    bias_col = cpad - 1
    slab = np.zeros((len(weights), rpad, cpad), np.float32)
    for l, (w, b) in enumerate(zip(weights, biases)):
        dout, din = w.shape
        slab[l, :dout, :din] = np.asarray(w, np.float32)
        slab[l, :dout, bias_col] = np.asarray(b, np.float32)
    return jnp.asarray(slab, dtype), bias_col


def _pick_batch_tile(batch, layer_dims, act_bytes, param_bytes):
    """Lane-tile: whole batch when small, else a multiple-of-128 tile that keeps
    double-buffered I/O + f32 intermediates + the param slab well inside VMEM,
    capped at 1024 lanes (mem-bound sweet spot)."""
    if batch <= 512:
        return batch
    d0 = layer_dims[0][0]
    d_last = layer_dims[-1][1]
    hid = max(dout for _, dout in layer_dims)
    per_lane = 2 * act_bytes * (d0 + d_last) + 4 * (d0 + 2 * hid)  # bytes per batch lane
    budget = (24 << 20) - 2 * param_bytes                          # stay inside scoped VMEM
    tb = min(max(budget // max(per_lane, 1), 128), 1024)
    tb = (tb // 128) * 128
    return min(tb, _round_up(batch, 128))


def mlp_forward(x, wb_slab, layer_dims, bias_col, act_fun, *, out_dtype=None):
    """Run the fused MLP Pallas kernel.

    x:        (batch, net_dims[0])  -- PyTorch layout; transposed once (fuses
                                       under jit) so batch is on the lane axis.
    wb_slab:  packed parameters from pack_params (its dtype sets the matmul dtype).
    """
    batch, d0 = x.shape
    d_last = layer_dims[-1][1]
    out_dtype = out_dtype or x.dtype

    xt = x.T.astype(wb_slab.dtype)          # (d0, batch): features x lanes
    act_bytes = np.dtype(wb_slab.dtype).itemsize
    param_bytes = wb_slab.size * act_bytes
    tb = _pick_batch_tile(batch, layer_dims, act_bytes, param_bytes)
    grid = (pl.cdiv(batch, tb),)

    kernel = _make_mlp_kernel(layer_dims, act_fun, bias_col)

    flops = 2 * batch * sum(din * dout for din, dout in layer_dims)
    transcendentals = batch * sum(dout for _, dout in layer_dims[:-1])
    bytes_accessed = (xt.size * act_bytes
                      + batch * d_last * np.dtype(out_dtype).itemsize
                      + param_bytes)

    out_t = pl.pallas_call(
        kernel,
        out_shape=jax.ShapeDtypeStruct((d_last, batch), out_dtype),
        grid_spec=pltpu.PrefetchScalarGridSpec(
            num_scalar_prefetch=0,
            grid=grid,
            in_specs=[
                pl.BlockSpec((d0, tb), lambda j: (0, j)),          # activations: tile lanes
                pl.BlockSpec(wb_slab.shape, lambda j: (0, 0, 0)),  # params: VMEM-resident
            ],
            out_specs=pl.BlockSpec((d_last, tb), lambda j: (0, j)),
        ),
        compiler_params=pltpu.CompilerParams(
            dimension_semantics=("parallel",)),
        cost_estimate=pl.CostEstimate(
            flops=flops, transcendentals=transcendentals,
            bytes_accessed=bytes_accessed),
    )(xt, wb_slab)

    return out_t.T                           # back to (batch, d_last)


def init_params(key, net_dims):
    """nn.Linear-style init; weights kept in PyTorch (out_features, in_features) layout."""
    weights, biases = [], []
    for i in range(len(net_dims) - 1):
        fan_in, fan_out = net_dims[i], net_dims[i + 1]
        key, kw, kb = jax.random.split(key, 3)
        bound = 1.0 / np.sqrt(fan_in)
        w = jax.random.uniform(kw, (fan_out, fan_in), jnp.float32, -bound, bound)
        b = jax.random.uniform(kb, (fan_out,), jnp.float32, -bound, bound)
        weights.append(w)
        biases.append(b)
    return weights, biases


def reference_forward(x, weights, biases, act_fun):
    """Pure-JAX reference mirroring the PyTorch forward with dropout p=0."""
    out = x
    n = len(weights)
    for i in range(n - 1):
        out = out @ weights[i].T + biases[i]
        out = act_fun(out)
    out = out @ weights[-1].T + biases[-1]
    return out


if __name__ == "__main__":
    act_fun = jnp.tanh                      # custom activation (constructor arg)
    net_dims = [16, 32, 32, 8]
    layer_dims = tuple((net_dims[i], net_dims[i + 1]) for i in range(len(net_dims) - 1))

    key = jax.random.PRNGKey(0)
    key, kx = jax.random.split(key)
    batch = 2048                            # lane-dense batch; exercises a 2-step grid
    x = jax.random.normal(kx, (batch, net_dims[0]), dtype=jnp.float32)

    weights, biases = init_params(key, net_dims)
    ref = reference_forward(x, weights, biases, act_fun)

    # --- float32 path (matches the pure-JAX reference) ---
    slab_f32, bias_col = pack_params(weights, biases, jnp.float32)
    fwd_f32 = jax.jit(functools.partial(
        mlp_forward, layer_dims=layer_dims, bias_col=bias_col, act_fun=act_fun))
    out = jax.block_until_ready(fwd_f32(x, slab_f32))
    np.testing.assert_allclose(np.asarray(out), np.asarray(ref), rtol=1e-5, atol=1e-5)

    # --- tiny batch (grid of 1, full-dim lane block) ---
    x_small = x[:8]
    out_small = jax.block_until_ready(fwd_f32(x_small, slab_f32))
    np.testing.assert_allclose(np.asarray(out_small), np.asarray(ref[:8]),
                               rtol=1e-5, atol=1e-5)

    # --- bf16 parameters/matmul inputs (MXU-native on v6e/v7x), f32 accumulate/bias/tanh ---
    slab_bf16, bias_col_b = pack_params(weights, biases, jnp.bfloat16)
    fwd_bf16 = jax.jit(functools.partial(
        mlp_forward, layer_dims=layer_dims, bias_col=bias_col_b, act_fun=act_fun,
        out_dtype=jnp.float32))
    out_bf16 = jax.block_until_ready(fwd_bf16(x, slab_bf16))
    np.testing.assert_allclose(np.asarray(out_bf16), np.asarray(ref),
                               rtol=1e-1, atol=1e-1)

    print("KERNEL_OK")
</pallas_src>

<mosaic_0001>
module attributes {stable_mosaic.version = 11 : i64} {
  func.func @kernel(%arg0: i32, %arg1: memref<16x1024xf32, #tpu.memory_space<vmem>>, %arg2: memref<3x32x128xf32, #tpu.memory_space<vmem>>, %arg3: memref<8x1024xf32, #tpu.memory_space<vmem>>) attributes {dimension_semantics = [#tpu.dimension_semantics<parallel>], iteration_bounds = array<i64: 2>, scalar_prefetch = 0 : i64, scratch_operands = 0 : i64, tpu.core_type = #tpu.core_type<tc>, window_params = [{transform_indices = @transform_0, window_bounds = array<i64: 16, 1024>}, {pipeline_mode = #tpu.pipeline_mode<synchronous>, transform_indices = @transform_1, window_bounds = array<i64: 3, 32, 128>}, {transform_indices = @transform_2, window_bounds = array<i64: 8, 1024>}]} {
    %c0 = arith.constant 0 : index
    %c0_0 = arith.constant 0 : index
    %0 = vector.load %arg1[%c0, %c0_0] : memref<16x1024xf32, #tpu.memory_space<vmem>>, vector<16x1024xf32>
    %c0_1 = arith.constant 0 : index
    %c0_2 = arith.constant 0 : index
    %c0_3 = arith.constant 0 : index
    %1 = vector.load %arg2[%c0_1, %c0_2, %c0_3] : memref<3x32x128xf32, #tpu.memory_space<vmem>>, vector<1x32x16xf32>
    %2 = vector.shape_cast %1 : vector<1x32x16xf32> to vector<32x16xf32>
    %c0_4 = arith.constant 0 : index
    %c0_5 = arith.constant 0 : index
    %c127 = arith.constant 127 : index
    %3 = vector.load %arg2[%c0_4, %c0_5, %c127] : memref<3x32x128xf32, #tpu.memory_space<vmem>>, vector<1x32x1xf32>
    %4 = vector.shape_cast %3 : vector<1x32x1xf32> to vector<32x1xf32>
    %cst = arith.constant dense<0.000000e+00> : vector<32x1024xf32>
    %5 = tpu.matmul %2, %0, %cst {dimension_numbers = #tpu.dot_dimension_numbers<[1], [0], [0], [1], [0, 0, 1, 1], [], []>} : vector<32x16xf32>, vector<16x1024xf32>, vector<32x1024xf32> -> vector<32x1024xf32>
    %6 = vector.broadcast %4 : vector<32x1xf32> to vector<32x1024xf32>
    %7 = arith.addf %5, %6 : vector<32x1024xf32>
    %8 = math.tanh %7 : vector<32x1024xf32>
    %c1 = arith.constant 1 : index
    %c0_6 = arith.constant 0 : index
    %c0_7 = arith.constant 0 : index
    %9 = vector.load %arg2[%c1, %c0_6, %c0_7] : memref<3x32x128xf32, #tpu.memory_space<vmem>>, vector<1x32x32xf32>
    %10 = vector.shape_cast %9 : vector<1x32x32xf32> to vector<32x32xf32>
    %c1_8 = arith.constant 1 : index
    %c0_9 = arith.constant 0 : index
    %c127_10 = arith.constant 127 : index
    %11 = vector.load %arg2[%c1_8, %c0_9, %c127_10] : memref<3x32x128xf32, #tpu.memory_space<vmem>>, vector<1x32x1xf32>
    %12 = vector.shape_cast %11 : vector<1x32x1xf32> to vector<32x1xf32>
    %cst_11 = arith.constant dense<0.000000e+00> : vector<32x1024xf32>
    %13 = tpu.matmul %10, %8, %cst_11 {dimension_numbers = #tpu.dot_dimension_numbers<[1], [0], [0], [1], [0, 0, 1, 1], [], []>} : vector<32x32xf32>, vector<32x1024xf32>, vector<32x1024xf32> -> vector<32x1024xf32>
    %14 = vector.broadcast %12 : vector<32x1xf32> to vector<32x1024xf32>
    %15 = arith.addf %13, %14 : vector<32x1024xf32>
    %16 = math.tanh %15 : vector<32x1024xf32>
    %c2 = arith.constant 2 : index
    %c0_12 = arith.constant 0 : index
    %c0_13 = arith.constant 0 : index
    %17 = vector.load %arg2[%c2, %c0_12, %c0_13] : memref<3x32x128xf32, #tpu.memory_space<vmem>>, vector<1x8x32xf32>
    %18 = vector.shape_cast %17 : vector<1x8x32xf32> to vector<8x32xf32>
    %c2_14 = arith.constant 2 : index
    %c0_15 = arith.constant 0 : index
    %c127_16 = arith.constant 127 : index
    %19 = vector.load %arg2[%c2_14, %c0_15, %c127_16] : memref<3x32x128xf32, #tpu.memory_space<vmem>>, vector<1x8x1xf32>
    %20 = vector.shape_cast %19 : vector<1x8x1xf32> to vector<8x1xf32>
    %cst_17 = arith.constant dense<0.000000e+00> : vector<8x1024xf32>
    %21 = tpu.matmul %18, %16, %cst_17 {dimension_numbers = #tpu.dot_dimension_numbers<[1], [0], [0], [1], [0, 0, 1, 1], [], []>} : vector<8x32xf32>, vector<32x1024xf32>, vector<8x1024xf32> -> vector<8x1024xf32>
    %22 = vector.broadcast %20 : vector<8x1xf32> to vector<8x1024xf32>
    %23 = arith.addf %21, %22 : vector<8x1024xf32>
    %c0_18 = arith.constant 0 : index
    %c0_19 = arith.constant 0 : index
    %24 = vector.load %arg3[%c0_18, %c0_19] : memref<8x1024xf32, #tpu.memory_space<vmem>>, vector<8x1024xf32>
    tpu.vector_store %arg3[%c0_18, %c0_19], %23 {strides = array<i32>} : memref<8x1024xf32, #tpu.memory_space<vmem>>, vector<8x1024xf32>,
    return
  }
  func.func @transform_0(%arg0: i32) -> (i32, i32) {
    %c0_i32 = arith.constant 0 : i32
    %c0_i32_0 = arith.constant 0 : i32
    return %c0_i32, %arg0 : i32, i32
  }
  func.func @transform_1(%arg0: i32) -> (i32, i32, i32) {
    %c0_i32 = arith.constant 0 : i32
    %c0_i32_0 = arith.constant 0 : i32
    %c0_i32_1 = arith.constant 0 : i32
    %c0_i32_2 = arith.constant 0 : i32
    return %c0_i32, %c0_i32_0, %c0_i32_1 : i32, i32, i32
  }
  func.func @transform_2(%arg0: i32) -> (i32, i32) {
    %c0_i32 = arith.constant 0 : i32
    %c0_i32_0 = arith.constant 0 : i32
    return %c0_i32, %arg0 : i32, i32
  }
}

</mosaic_0001>

<bundles_post_ra>
// kernel: mlp_forward.1
= control target key start
LH: loop header
LB: loop body
LE: loop exit
PB: predicated region body
PF: predicated region fallthrough
CT: control target
= control target key end

     0   :  { %7 = vsyncpa [#allocation3], 0  ;;  %s2236_s0 = inlined_call_operand.hbm [shape: f32[16,2048], index: 0, kind: input, shape index: {}]   ;;  %s2237_s1 = inlined_call_operand.hbm [shape: f32[3,32,128], index: 1, kind: input, shape index: {}]   ;;  %s2238_s2 = inlined_call_operand.hbm [shape: f32[8,2048], index: 2, kind: output, shape index: {}]  }
   0x1   :  { %9 = vsyncpa [#allocation3 + $0x1], 0 }
   0x2   :  { %10 = vsyncpa [#allocation6], 0 }
   0x3   :  { %11 = vsyncpa [#allocation4], 0 }
   0x4   :  { %13 = vsyncpa [#allocation4 + $0x1], 0  ;;  %s1831_s9 = smov 0   ;;  %s1833_s10 = smov 0  }
   0x5   :  { %s1835_s11 = smov 0   ;;  %s1837_s12 = smov 0  }
   0x6 LB: > { %s1852_s13 = sadd.s32 4294967295, %s1804_s12   ;;  %s1434_s14 = sadd.s32 4294967294, %s1804_s12   ;;  %s1804_s12 = sphi %s1837_s12, %s2260_s12   ;;  %s1800_s11 = sphi %s1835_s11, %s2259_s11   ;;  %s1796_s10 = sphi %s1833_s10, %s2258_s10   ;;  %s1792_s9 = sphi %s1831_s9, %s2257_s9  }
   0x7   : > { %s1856_s15 = sadd.s32 1, %s1804_s12   ;;  %s26_s16 = sadd.s32 1, %s1800_s11 }
   0x8   : > { %s23_s17 = ssub.s32 %s1804_s12, %s1856_s15  ;;  %p33_p0 = scmp.ne.s32.totalorder %s1800_s11, %s1796_s10 }
   0x9   : > { %p24_p1 = scmp.eq.s32.totalorder %s23_s17, 0  ;;  %p34_p2 = scmp.eq.s32.totalorder %s1804_s12, 0 }
   0xa   : > { %p39_p3 = scmp.ne.s32.totalorder %s1796_s10, %s1792_s9  ;;  %p2242_p4 = scmp.eq.s32.totalorder %s1852_s13, 0 }
   0xb   : > { %s1868_s18 = scalar_select %p24_p1, %s1800_s11, %s26_s16  }
   0xc   : > { %p1870_p5 = por %p34_p2, %p33_p0  ;;  %p1876_p6 = por %p2242_p4, %p39_p3 }
   0xd   : > { %p84_p7 = scmp.eq.s32.totalorder %s1852_s13, 1  ;;  %p90_p8 = scmp.eq.s32.totalorder %s1434_s14, 1 }
   0xe   : > { %s2244_s20 = scalar_select %p1876_p6, 1, 0 }
   0xf   : > { %p1435_p9 = scmp.ge.s32.totalorder %s1804_s12, 1  ;;  %p97_p10 = scmp.lt.s32.totalorder %s1804_s12, 3 }
  0x10   : > { %p1883_p11 = por %p84_p7, %p33_p0  ;;  %p1887_p12 = por %p90_p8, %p39_p3 }
  0x11   : > { %p1891_p13 = pnand %p1435_p9, %p97_p10  ;;  %s1806_s24 = smov [#allocation5]  }
  0x12   : > { %s2245_s21 = scalar_select %p1883_p11, 1, 0 }
  0x13   : > { %s2246_s22 = scalar_select %p1887_p12, 1, 0 }
  0x14   : > { %s2247_s23 = scalar_select %p1891_p13, 1, 0 }
  0x15   : > { %p1496_p1 = pneg %p1891_p13  ;;  %s109_s25 = sshll.u32 %s1806_s24, 4  ;;  %s110_s25 = int_to_ptr.vmem [resolvable:$true] %s109_s25 }
  0x16   : > { %p1509_p3 = scmp.lt.s32.totalorder %s1804_s12, 2  ;;  %s123_s27 = sand.u32 1, %s1800_s11  }
  0x17   : > { %p1899_p2 = pnand %p1496_p1, %p2242_p4  ;;  %s1693_s28 = scalar_lea.vmem %s110_s25, 1536 }
  0x18   : > { %p1694_p8 = scmp.ne.s32.totalorder %s110_s25, %s1693_s28  ;;  %p1701_p12 = scmp.lt.s32.totalorder %s110_s25, %s110_s25 }
  0x19   : > { %p1684_p7 = pneg %p1899_p2  ;;  %p1702_p11 = scmp.lt.s32.totalorder %s1693_s28, %s1693_s28 }
  0x1b   : > { %p1696_p9 = pnand %p1694_p8, %p1684_p7  ;;  %p1703_p6 = por %p1702_p11, %p1701_p12 }
  0x1d   : > { %p1697_p10 = pneg %p1696_p9 }
  0x1f   : > { %p1704_p13 = pnand %p1703_p6, %p1697_p10 }
  0x21   : > { %1707 = shalt.err (!%p1704_p13)
}
  0x22   : > { %s1807_s29 = smov 128   ;;  %s1808_s30 = smov 8  }
  0x23   : > { %1499 = dma.hbm_to_vmem [thread:$0]  (!%p1899_p2), %s2237_s1, 1536, %s110_s25, [#allocation6], %s1807_s29, %s1807_s29, %s1808_s30  }
  0x24   : > { %p1917_p1 = pnand %p1509_p3, %p1870_p5  ;;  %s1438_s6 = sshll.u32 %s123_s27, 7 }
  0x25   : > { %s1486_s7 = sshll.u32 %s1804_s12, 10  ;;  %s127_s17 = scalar_lea.vmem [#allocation2], %s1438_s6 }
  0x26   : > { %s1925_s16 = scalar_lea.hbm %s2236_s0, %s1486_s7  ;;  %s134_s24 = sshll.u32 %s127_s17, 4  ;;  %s1927_s24 = int_to_ptr.vmem [resolvable:$true] %s134_s24 }
  0x27   : > { %s1929_s19 = scalar_lea.sflag [#allocation3], %s123_s27  ;;  %s1708_s25 = scalar_lea.hbm %s1925_s16, 2048 }
  0x28   : > { %p1709_p5 = scmp.ne.s32.totalorder %s1925_s16, %s1708_s25  ;;  %p1710_p6 = pneg %p1917_p1 }
  0x29   : > { %s1713_s29 = scalar_lea.hbm %s2236_s0, 4096  ;;  %p1714_p13 = scmp.lt.s32.totalorder %s1925_s16, %s2236_s0 }
  0x2a   : > { %p1711_p11 = pnand %p1710_p6, %p1709_p5  ;;  %p1715_p2 = scmp.lt.s32.totalorder %s1713_s29, %s1708_s25 }
  0x2c   : > { %p1712_p12 = pneg %p1711_p11  ;;  %p1716_p3 = por %p1715_p2, %p1714_p13 }
  0x2e   : > { %p1717_p7 = pnand %p1716_p3, %p1712_p12 }
  0x30   : > { %1720 = shalt.err (!%p1717_p7)
}
  0x31   : > { %s1721_s27 = scalar_lea.vmem %s1927_s24, 2048  ;;  %s1809_s4 = smov [#allocation2]  }
  0x32   : > { %p1722_p8 = scmp.ne.s32.totalorder %s1927_s24, %s1721_s27  ;;  %s1726_s6 = sshll.u32 %s1809_s4, 4  ;;  %s1727_s6 = int_to_ptr.vmem [resolvable:$false] %s1726_s6 }
  0x33   : > { %s1728_s7 = scalar_lea.vmem %s1727_s6, 4096  ;;  %p1729_p5 = scmp.lt.s32.totalorder %s1927_s24, %s1727_s6 }
  0x34   : > { %p1724_p9 = pnand %p1722_p8, %p1710_p6  ;;  %p1730_p11 = scmp.lt.s32.totalorder %s1728_s7, %s1721_s27 }
  0x36   : > { %p1725_p10 = pneg %p1724_p9  ;;  %p1731_p0 = por %p1730_p11, %p1729_p5 }
  0x38   : > { %p1732_p4 = pnand %p1731_p0, %p1725_p10 }
  0x3a   : > { %1735 = shalt.err (!%p1732_p4)
}
  0x3b   : > { %s1810_s8 = smov 2048   ;;  %s1811_s14 = smov 1024  }
  0x3c   : > { %s1812_s17 = smov 64   ;;  %p2250_p6 = scmp.ne.s32.totalorder %s2247_s23, 0 }
  0x3d   : > { %1503 = dma.hbm_to_vmem [thread:$0]  (!%p1917_p1), %s1925_s16, 2048, %s1927_s24, %s1929_s19, %s1810_s8, %s1811_s14, %s1812_s17  }
  0x3e   : > { %146 = sbr.rel (%p2250_p6) target bundleno = 771 (0x303), region = 28  ;;  %s1953_s25 = sand.u32 (!%p2250_p6), 1, %s1796_s10  }
  0x3f   : > { %s1442_s26 = sshll.u32 (!%p2250_p6), %s1953_s25, 7  ;;  %s149_s28 = scalar_lea.sflag (!%p2250_p6), [#allocation3], %s1953_s25 }
  0x40   : > { %s1957_s29 = scalar_lea.vmem (!%p2250_p6), [#allocation2], %s1442_s26  ;;  %p2251_p4 = scmp.ne.s32.totalorder (!%p2250_p6), %s2244_s20, 0 }
  0x43   : > { %1779 = dma.done.wait (%p2251_p4), %s149_s28, 2048  }
  0x44   : > { %1781 = vsyncadd (%p2251_p4), %s149_s28, 4294965248  ;;  %p2252_p0 = scmp.eq.s32.totalorder %s1852_s13, 0 }
  0x46   : > { %1783 = dma.done.wait (%p2252_p0), [#allocation6], 1536   ;;  %p2253_p1 = pmov %p2252_p0 }
  0x47   : > { %v1813_v0 = vmov 0.0   ;;  %v1814_v1 = vmov 127   ;;  %v188_v2 = vld [vmem:[%s1957_s29 + $0x48] sm:$0xff]  ;;  %v190_v3 = vld [vmem:[%s1957_s29 + $0x58] sm:$0xff]  ;;  %v187_v4 = vld [vmem:[%s1957_s29 + $0x40] sm:$0xff]  ;;  %vm219_vm0 = vcmask 130048  }
  0x48   : > { %1785 = vsyncadd (%p2253_p1), [#allocation6], 4294965760  ;;  %292 = vmatprep.mubr.f32.mxu0 %v1813_v0  ;;  %381 = vmatprep.mubr.f32.mxu1 %v1813_v0  ;;  %v189_v5 = vld [vmem:[%s1957_s29 + $0x50] sm:$0xff]  ;;  %v180_v6 = vld [vmem:[%s1957_s29 + $0x8] sm:$0xff]  ;;  %vm641_vm1 = vcmask 261120   ;;  %s1444_s20 = sshll.u32 %s1953_s25, 6 }
  0x49   : > { %1553 = vset.pattern.permute.xlu1 %v1814_v1  ;;  %1552 = vset.pattern.permute.xlu0 %v1814_v1  ;;  %v182_v7 = vld [vmem:[%s1957_s29 + $0x18] sm:$0xff]  ;;  %v179_v8 = vld [vmem:[%s1957_s29] sm:$0xff]  ;;  %v181_v9 = vld [vmem:[%s1957_s29 + $0x10] sm:$0xff]  ;;  %s176_s23 = scalar_lea.vmem [#allocation7], %s1444_s20  ;;  %s1487_s5 = sshll.u32 %s1852_s13, 10 }
  0x4a   : > { %256 = vmatprep.subr.mxu0 %v188_v2  ;;  %345 = vmatprep.subr.mxu1 %v190_v3  ;;  %v195_v10 = vld [vmem:[#allocation5] sm:$0xff]  ;;  %v192_v11 = vld [vmem:[%s1957_s29 + $0x68] sm:$0xff]  ;;  %v194_v12 = vld [vmem:[%s1957_s29 + $0x78] sm:$0xff]  ;;  %s1354_s16 = sshll.u32 %s176_s23, 4  ;;  %s2199_s30 = scalar_lea.hbm %s2238_s2, %s1487_s5  ;;  %s1355_s16 = int_to_ptr.vmem [resolvable:$true] %s1354_s16 }
  0x4b   : > { %257 = vmatpush1.msra.mxu0 %v187_v4  ;;  %346 = vmatpush1.msra.mxu1 %v189_v5  ;;  %v191_v13 = vld [vmem:[%s1957_s29 + $0x60] sm:$0xff]  ;;  %v193_v14 = vld [vmem:[%s1957_s29 + $0x70] sm:$0xff]  ;;  %v196_v15 = vld [vmem:[#allocation5 + $0x8] sm:$0xff]  ;;  %s1340_s3 = scalar_lea.sflag [#allocation4], %s1953_s25  ;;  %s1736_s27 = scalar_lea.vmem %s1355_s16, 1024 }
  0x4c   : > { %258 = vmatprep.subr.mxu0 %v180_v6  ;;  %347 = vmatprep.subr.mxu1 %v182_v7  ;;  %v184_v16 = vld [vmem:[%s1957_s29 + $0x28] sm:$0xff]  ;;  %v186_v17 = vld [vmem:[%s1957_s29 + $0x38] sm:$0xff]  ;;  %v183_v18 = vld [vmem:[%s1957_s29 + $0x20] sm:$0xff]  ;;  %p1737_p12 = scmp.ne.s32.totalorder %s1355_s16, %s1736_s27  ;;  %p2254_p13 = scmp.ne.s32.totalorder %s2245_s21, 0 }
  0x4d   : > { %259 = vmatpush1.msra.mxu0 %v179_v8  ;;  %348 = vmatpush1.msra.mxu1 %v181_v9  ;;  %v185_v19 = vld [vmem:[%s1957_s29 + $0x30] sm:$0xff]  ;;  %v198_v21 = vld [vmem:[#allocation5 + $0x18] sm:$0xff]  ;;  %v2011_v24 = vld [vmem:[#allocation5 + $0x28] sm:$0xff]  ;;  %s1815_s13 = smov [#allocation7]  }
  0x4e   : > { %1445 = vmatmul.mubr.msk.f32.vlgmr.msra.gmra.mxu0 %vm219_vm0, %v195_v10  ;;  %1449 = vmatmul.mubr.msk.f32.vlgmr.msra.gmra.mxu1 %vm219_vm0, %v195_v10  ;;  %v197_v20 = vld [vmem:[#allocation5 + $0x10] sm:$0xff]  ;;  %v2001_v22 = vld [vmem:[#allocation5 + $0x38] sm:$0xff]  ;;  %v2013_v25 = vld [vmem:[#allocation5 + $0x20] sm:$0xff]  ;;  %p1738_p2 = pnand %p1737_p12, %p2254_p13  ;;  %s1740_s4 = sshll.u32 %s1815_s13, 4  ;;  %s1741_s4 = int_to_ptr.vmem [resolvable:$false] %s1740_s4 }
  0x4f   : > { %298 = vmatprep.mubr.f32.mxu0 %v1813_v0  ;;  %387 = vmatprep.mubr.f32.mxu1 %v1813_v0  ;;  %v2003_v23 = vld [vmem:[#allocation5 + $0x30] sm:$0xff]  ;;  %v2021_v26 = vld [vmem:[#allocation5 + $0x40] sm:$0xff]  ;;  %s1742_s6 = scalar_lea.vmem %s1741_s4, 2048  ;;  %p1743_p7 = scmp.lt.s32.totalorder %s1355_s16, %s1741_s4 }
  0x50   : > { %434 = vmatprep.subr.mxu0 %v192_v11  ;;  %523 = vmatprep.subr.mxu1 %v194_v12  ;;  %p1739_p3 = pneg %p1738_p2  ;;  %p1744_p8 = scmp.lt.s32.totalorder %s1742_s6, %s1736_s27 }
  0x51   : > { %435 = vmatpush1.msra.mxu0 %v191_v13  ;;  %524 = vmatpush1.msra.mxu1 %v193_v14 }
  0x52   : > { %1446 = vmatmul.mubr.msk.f32.gmra.mxu0 %vm219_vm0, %v196_v15  ;;  %1450 = vmatmul.mubr.msk.f32.gmra.mxu1 %vm219_vm0, %v196_v15  ;;  %p1745_p9 = por %p1744_p8, %p1743_p7 }
  0x53   : > { %304 = vmatprep.mubr.f32.mxu0 %v1813_v0  ;;  %393 = vmatprep.mubr.f32.mxu1 %v1813_v0 }
  0x54   : > { %436 = vmatprep.subr.mxu0 %v184_v16  ;;  %525 = vmatprep.subr.mxu1 %v186_v17  ;;  %p1746_p10 = pnand %p1745_p9, %p1739_p3 }
  0x55   : > { %437 = vmatpush1.msra.mxu0 %v183_v18  ;;  %526 = vmatpush1.msra.mxu1 %v185_v19 }
  0x56   : > { %1447 = vmatmul.mubr.msk.f32.gmra.mxu0 %vm219_vm0, %v197_v20  ;;  %1451 = vmatmul.mubr.msk.f32.gmra.mxu1 %vm219_vm0, %v197_v20 }
  0x57   : > { %310 = vmatprep.mubr.f32.mxu0 %v1813_v0  ;;  %399 = vmatprep.mubr.f32.mxu1 %v1813_v0 }
  0x58   : > { %206 = vperm.xlu1 %1553, %v196_v15   ;;  %216 = vperm.xlu0 %1552, %v198_v21  }
  0x5a   : > { %1448 = vmatmul.mubr.msk.f32.gmra.mxu0 %vm219_vm0, %v198_v21  ;;  %1452 = vmatmul.mubr.msk.f32.gmra.mxu1 %vm219_vm0, %v198_v21 }
  0x5b   : > { %470 = vmatprep.mubr.f32.mxu0 %v1813_v0  ;;  %559 = vmatprep.mubr.f32.mxu1 %v1813_v0 }
  0x5c   : > { %201 = vperm.xlu1 %1553, %v195_v10   ;;  %211 = vperm.xlu0 %1552, %v197_v20  }
  0x5e   : > { %1453 = vmatmul.mubr.msk.f32.vlgmr.msra.gmra.mxu0 %vm219_vm0, %v195_v10  ;;  %1457 = vmatmul.mubr.msk.f32.vlgmr.msra.gmra.mxu1 %vm219_vm0, %v195_v10 }
  0x5f   : > { %476 = vmatprep.mubr.f32.mxu0 %v1813_v0  ;;  %565 = vmatprep.mubr.f32.mxu1 %v1813_v0 }
  0x60   : > { %638 = vperm.xlu0 %1552, %v2001_v22   ;;  %633 = vperm.xlu1 %1553, %v2003_v23  }
  0x62   : > { %1454 = vmatmul.mubr.msk.f32.gmra.mxu0 %vm219_vm0, %v196_v15  ;;  %1458 = vmatmul.mubr.msk.f32.gmra.mxu1 %vm219_vm0, %v196_v15 }
  0x63   : > { %482 = vmatprep.mubr.f32.mxu0 %v1813_v0  ;;  %571 = vmatprep.mubr.f32.mxu1 %v1813_v0 }
  0x64   : > { %628 = vperm.xlu0 %1552, %v2011_v24   ;;  %623 = vperm.xlu1 %1553, %v2013_v25  }
  0x66   : > { %1455 = vmatmul.mubr.msk.f32.gmra.mxu0 %vm219_vm0, %v197_v20  ;;  %1459 = vmatmul.mubr.msk.f32.gmra.mxu1 %vm219_vm0, %v197_v20 }
  0x67   : > { %488 = vmatprep.mubr.f32.mxu0 %v1813_v0  ;;  %577 = vmatprep.mubr.f32.mxu1 %v1813_v0 }
  0x68   : > { %1042 = vperm.xlu0 %1552, %v2021_v26  }
  0x6a   : > { %1456 = vmatmul.mubr.msk.f32.gmra.mxu0 %vm219_vm0, %v198_v21  ;;  %1460 = vmatmul.mubr.msk.f32.gmra.mxu1 %vm219_vm0, %v198_v21 }
  0x6b   : > { %714 = vmatprep.mubr.f32.mxu0 %v1813_v0  ;;  %803 = vmatprep.mubr.f32.mxu1 %v1813_v0 }
  0xd3   : > { %v2032_v27 = vpop.permute.xlu1 %206  ;;  %v2034_v32 = vpop.permute.xlu0 %216 }
  0xd7   : > { %v2036_v33 = vpop.permute.xlu1 %201  ;;  %v2041_v43 = vpop.permute.xlu0 %211 }
 0x10e   : > { %v294_v28 = vpop.f32.mrf.mxu0  ;;  %v383_v29 = vpop.f32.mrf.mxu1 }
 0x10f   : > { %v295_v36 = vadd.f32 %v294_v28, %v2036_v33  ;;  %v384_v5 = vadd.f32 %v383_v29, %v2036_v33 }
 0x110   : > { %v296_v30 = vpop.f32.mrf.mxu0  ;;  %v385_v31 = vpop.f32.mrf.mxu1 }
 0x111   : > { %v297_v39 = vadd.f32 %v296_v30, %v2036_v33  ;;  %1554 = vtanh.f32 %v295_v36  ;;  %v386_v2 = vadd.f32 %v385_v31, %v2036_v33 }
 0x112   : > { %v300_v34 = vpop.f32.mrf.mxu0  ;;  %v389_v35 = vpop.f32.mrf.mxu1 }
 0x113   : > { %v301_v40 = vadd.f32 %v300_v34, %v2032_v27  ;;  %1556 = vtanh.f32 %v297_v39  ;;  %v390_v1 = vadd.f32 %v389_v35, %v2032_v27 }
 0x114   : > { %v302_v37 = vpop.f32.mrf.mxu0  ;;  %v391_v38 = vpop.f32.mrf.mxu1 }
 0x115   : > { %v303_v44 = vadd.f32 %v302_v37, %v2032_v27  ;;  %1558 = vtanh.f32 %v301_v40  ;;  %v392_v61 = vadd.f32 %v391_v38, %v2032_v27 }
 0x116   : > { %v306_v41 = vpop.f32.mrf.mxu0  ;;  %v395_v42 = vpop.f32.mrf.mxu1 }
 0x117   : > { %v307_v45 = vadd.f32 %v306_v41, %v2041_v43  ;;  %1560 = vtanh.f32 %v303_v44  ;;  %v396_v60 = vadd.f32 %v395_v42, %v2041_v43 }
 0x118   : > { %v308_v46 = vpop.f32.mrf.mxu0  ;;  %v397_v47 = vpop.f32.mrf.mxu1 }
 0x119   : > { %v309_v48 = vadd.f32 %v308_v46, %v2041_v43  ;;  %1562 = vtanh.f32 %v307_v45  ;;  %v398_v57 = vadd.f32 %v397_v47, %v2041_v43 }
 0x11a   : > { %v312_v49 = vpop.f32.mrf.mxu0  ;;  %v401_v50 = vpop.f32.mrf.mxu1 }
 0x11b   : > { %v313_v51 = vadd.f32 %v312_v49, %v2034_v32  ;;  %1564 = vtanh.f32 %v309_v48  ;;  %v402_v54 = vadd.f32 %v401_v50, %v2034_v32 }
 0x11c   : > { %v314_v52 = vpop.f32.mrf.mxu0  ;;  %v403_v53 = vpop.f32.mrf.mxu1 }
 0x11d   : > { %v315_v55 = vadd.f32 %v314_v52, %v2034_v32  ;;  %v404_v56 = vadd.f32 %v403_v53, %v2034_v32  ;;  %1566 = vtanh.f32 %v313_v51 }
 0x11e   : > { %v2051_v58 = vpop.f32.mrf.mxu0  ;;  %v2053_v59 = vpop.f32.mrf.mxu1 }
 0x11f   : > { %1568 = vtanh.f32 %v315_v55  ;;  %v2064_v8 = vpop.eup %1554  ;;  %v473_v53 = vadd.f32 %v2051_v58, %v2036_v33 }
 0x120   : > { %1570 = vtanh.f32 %v404_v56  ;;  %v474_v62 = vpop.f32.mrf.mxu0  ;;  %v2057_v63 = vpop.f32.mrf.mxu1 }
 0x121   : > { %1572 = vtanh.f32 %v402_v54  ;;  %v1557_v9 = vpop.eup %1556  ;;  %v475_v13 = vadd.f32 %v474_v62, %v2036_v33  ;;  %v564_v52 = vadd.f32 %v2057_v63, %v2036_v33 }
 0x122   : > { %1574 = vtanh.f32 %v398_v57  ;;  %v478_v3 = vpop.f32.mrf.mxu0  ;;  %v2061_v4 = vpop.f32.mrf.mxu1 }
 0x123   : > { %1576 = vtanh.f32 %v396_v60  ;;  %v1559_v12 = vpop.eup %1558  ;;  %v479_v15 = vadd.f32 %v478_v3, %v2032_v27 }
 0x124   : > { %1578 = vtanh.f32 %v392_v61  ;;  %v480_v6 = vpop.f32.mrf.mxu0  ;;  %v569_v7 = vpop.f32.mrf.mxu1 }
 0x125   : > { %1580 = vtanh.f32 %v390_v1  ;;  %v1561_v14 = vpop.eup %1560  ;;  %v481_v47 = vadd.f32 %v480_v6, %v2032_v27  ;;  %v570_v49 = vadd.f32 %v569_v7, %v2032_v27 }
 0x126   : > { %1582 = vtanh.f32 %v386_v2  ;;  %v484_v10 = vpop.f32.mrf.mxu0  ;;  %v573_v11 = vpop.f32.mrf.mxu1 }
 0x127   : > { %1584 = vtanh.f32 %v384_v5  ;;  %v1563_v18 = vpop.eup %1562  ;;  %v485_v44 = vadd.f32 %v484_v10, %v2041_v43  ;;  %v574_v46 = vadd.f32 %v573_v11, %v2041_v43 }
 0x128   : > { %v486_v16 = vpop.f32.mrf.mxu0  ;;  %v575_v17 = vpop.f32.mrf.mxu1  ;;  %1586 = vtanh.f32 %v475_v13 }
 0x129   : > { %v487_v19 = vadd.f32 %v486_v16, %v2041_v43  ;;  %v1565_v20 = vpop.eup %1564  ;;  %1588 = vtanh.f32 %v479_v15  ;;  %v576_v41 = vadd.f32 %v575_v17, %v2041_v43  ;;  %v568_v43 = vadd.f32 %v2061_v4, %v2032_v27 }
 0x12a   : > { %v490_v21 = vpop.f32.mrf.mxu0  ;;  %v579_v28 = vpop.f32.mrf.mxu1  ;;  %v562_v27 = vadd.f32 %v2053_v59, %v2036_v33 }
 0x12b   : > { %v1567_v29 = vpop.eup %1566  ;;  %v491_v30 = vadd.f32 %v490_v21, %v2034_v32  ;;  %1590 = vtanh.f32 %v487_v19  ;;  %v580_v37 = vadd.f32 %v579_v28, %v2034_v32 }
 0x12c   : > { %v1569_v31 = vpop.eup %1568  ;;  %v492_v34 = vpop.f32.mrf.mxu0 }
 0x12d   : > { %v581_v35 = vpop.f32.mrf.mxu1  ;;  %v1571_v36 = vpop.eup %1570  ;;  %v493_v38 = vadd.f32 %v492_v34, %v2034_v32  ;;  %674 = vmatprep.subr.mxu0 %v1569_v31  ;;  %1592 = vtanh.f32 %v491_v30 }
 0x12e   : > { %v582_v39 = vadd.f32 %v581_v35, %v2034_v32  ;;  %v1573_v40 = vpop.eup %1572  ;;  %763 = vmatprep.subr.mxu1 %v1571_v36  ;;  %675 = vmatpush1.msra.mxu0 %v1567_v29 }
 0x12f   : > { %v1575_v42 = vpop.eup %1574  ;;  %1594 = vtanh.f32 %v493_v38  ;;  %764 = vmatpush1.msra.mxu1 %v1573_v40  ;;  %676 = vmatprep.subr.mxu0 %v1565_v20 }
 0x130   : > { %v1577_v45 = vpop.eup %1576  ;;  %1596 = vtanh.f32 %v582_v39  ;;  %765 = vmatprep.subr.mxu1 %v1575_v42  ;;  %677 = vmatpush1.msra.mxu0 %v1563_v18 }
 0x131   : > { %v1579_v32 = vpop.eup %1578  ;;  %1598 = vtanh.f32 %v580_v37  ;;  %766 = vmatpush1.msra.mxu1 %v1577_v45  ;;  %678 = vmatprep.subr.mxu0 %v1561_v14 }
 0x132   : > { %v1581_v48 = vpop.eup %1580  ;;  %1600 = vtanh.f32 %v576_v41  ;;  %767 = vmatprep.subr.mxu1 %v1579_v32  ;;  %679 = vmatpush1.msra.mxu0 %v1559_v12 }
 0x133   : > { %v1583_v50 = vpop.eup %1582  ;;  %1602 = vtanh.f32 %v485_v44  ;;  %768 = vmatpush1.msra.mxu1 %v1581_v48  ;;  %680 = vmatprep.subr.mxu0 %v1557_v9 }
 0x134   : > { %v1585_v51 = vpop.eup %1584  ;;  %1604 = vtanh.f32 %v574_v46  ;;  %769 = vmatprep.subr.mxu1 %v1583_v50  ;;  %681 = vmatpush1.msra.mxu0 %v2064_v8 }
 0x135   : > { %1606 = vtanh.f32 %v481_v47  ;;  %770 = vmatpush1.msra.mxu1 %v1585_v51  ;;  %1461 = vmatmul.mubr.msk.f32.vlgmr.msra.gmra.mxu0 %vm641_vm1, %v2013_v25  ;;  %v1587_v54 = vpop.eup %1586 }
 0x136   : > { %1608 = vtanh.f32 %v570_v49  ;;  %1465 = vmatmul.mubr.msk.f32.vlgmr.msra.gmra.mxu1 %vm641_vm1, %v2013_v25  ;;  %720 = vmatprep.mubr.f32.mxu0 %v1813_v0  ;;  %v1589_v55 = vpop.eup %1588 }
 0x137   : > { %1610 = vtanh.f32 %v568_v43  ;;  %809 = vmatprep.mubr.f32.mxu1 %v1813_v0 }
 0x138   : > { %1612 = vtanh.f32 %v564_v52  ;;  %v1591_v56 = vpop.eup %1590 }
 0x139   : > { %1614 = vtanh.f32 %v473_v53  ;;  %1462 = vmatmul.mubr.msk.f32.gmra.mxu0 %vm641_vm1, %v2011_v24 }
 0x13a   : > { %1616 = vtanh.f32 %v562_v27  ;;  %1466 = vmatmul.mubr.msk.f32.gmra.mxu1 %vm641_vm1, %v2011_v24  ;;  %726 = vmatprep.mubr.f32.mxu0 %v1813_v0  ;;  %v1593_v33 = vpop.eup %1592 }
 0x13b   : > { %815 = vmatprep.mubr.f32.mxu1 %v1813_v0 }
 0x13c   : > { %v1595_v57 = vpop.eup %1594 }
 0x13d   : > { %v1597_v58 = vpop.eup %1596  ;;  %1463 = vmatmul.mubr.msk.f32.gmra.mxu0 %vm641_vm1, %v2003_v23  ;;  %852 = vmatprep.subr.mxu0 %v1595_v57 }
 0x13e   : > { %v1599_v59 = vpop.eup %1598  ;;  %1467 = vmatmul.mubr.msk.f32.gmra.mxu1 %vm641_vm1, %v2003_v23  ;;  %941 = vmatprep.subr.mxu1 %v1597_v58 }
 0x13f   : > { %v1601_v60 = vpop.eup %1600  ;;  %853 = vmatpush1.msra.mxu0 %v1593_v33  ;;  %942 = vmatpush1.msra.mxu1 %v1599_v59 }
 0x140   : > { %v1603_v61 = vpop.eup %1602  ;;  %854 = vmatprep.subr.mxu0 %v1591_v56  ;;  %943 = vmatprep.subr.mxu1 %v1601_v60 }
 0x141   : > { %v1605_v62 = vpop.eup %1604  ;;  %732 = vmatprep.mubr.f32.mxu0 %v1813_v0  ;;  %821 = vmatprep.mubr.f32.mxu1 %v1813_v0 }
 0x142   : > { %v1607_v63 = vpop.eup %1606  ;;  %855 = vmatpush1.msra.mxu0 %v1603_v61  ;;  %944 = vmatpush1.msra.mxu1 %v1605_v62 }
 0x143   : > { %v1609_v1 = vpop.eup %1608  ;;  %1464 = vmatmul.mubr.msk.f32.gmra.mxu0 %vm641_vm1, %v2001_v22  ;;  %1468 = vmatmul.mubr.msk.f32.gmra.mxu1 %vm641_vm1, %v2001_v22 }
 0x144   : > { %v1611_v2 = vpop.eup %1610  ;;  %856 = vmatprep.subr.mxu0 %v1607_v63  ;;  %945 = vmatprep.subr.mxu1 %v1609_v1 }
 0x145   : > { %v1613_v3 = vpop.eup %1612  ;;  %857 = vmatpush1.msra.mxu0 %v1589_v55  ;;  %946 = vmatpush1.msra.mxu1 %v1611_v2 }
 0x146   : > { %v1615_v4 = vpop.eup %1614  ;;  %858 = vmatprep.subr.mxu0 %v1587_v54  ;;  %947 = vmatprep.subr.mxu1 %v1613_v3 }
 0x147   : > { %v1617_v5 = vpop.eup %1616  ;;  %859 = vmatpush1.msra.mxu0 %v1615_v4  ;;  %892 = vmatprep.mubr.f32.mxu0 %v1813_v0 }
 0x148   : > { %948 = vmatpush1.msra.mxu1 %v1617_v5  ;;  %981 = vmatprep.mubr.f32.mxu1 %v1813_v0 }
 0x149   : > { %1469 = vmatmul.mubr.msk.f32.vlgmr.msra.gmra.mxu0 %vm641_vm1, %v2013_v25  ;;  %1473 = vmatmul.mubr.msk.f32.vlgmr.msra.gmra.mxu1 %vm641_vm1, %v2013_v25  ;;  %v2135_v25 = vpop.permute.xlu1 %633 }
 0x14a   : > { %898 = vmatprep.mubr.f32.mxu0 %v1813_v0  ;;  %987 = vmatprep.mubr.f32.mxu1 %v1813_v0 }
 0x14d   : > { %1470 = vmatmul.mubr.msk.f32.gmra.mxu0 %vm641_vm1, %v2011_v24  ;;  %1474 = vmatmul.mubr.msk.f32.gmra.mxu1 %vm641_vm1, %v2011_v24  ;;  %v2139_v12 = vpop.permute.xlu1 %623 }
 0x14e   : > { %904 = vmatprep.mubr.f32.mxu0 %v1813_v0  ;;  %993 = vmatprep.mubr.f32.mxu1 %v1813_v0 }
 0x151   : > { %1471 = vmatmul.mubr.msk.f32.gmra.mxu0 %vm641_vm1, %v2003_v23  ;;  %1475 = vmatmul.mubr.msk.f32.gmra.mxu1 %vm641_vm1, %v2003_v23  ;;  %v2137_v23 = vpop.permute.xlu0 %638 }
 0x152   : > { %910 = vmatprep.mubr.f32.mxu0 %v1813_v0  ;;  %999 = vmatprep.mubr.f32.mxu1 %v1813_v0 }
 0x155   : > { %1472 = vmatmul.mubr.msk.f32.gmra.mxu0 %vm641_vm1, %v2001_v22  ;;  %1476 = vmatmul.mubr.msk.f32.gmra.mxu1 %vm641_vm1, %v2001_v22  ;;  %v2142_v15 = vpop.permute.xlu0 %628 }
 0x156   : > { %1111 = vmatprep.mubr.f32.mxu0 %v1813_v0  ;;  %1182 = vmatprep.mubr.f32.mxu1 %v1813_v0 }
 0x1f5   : > { %v716_v24 = vpop.f32.mrf.mxu0 }
 0x1f6   : > { %v805_v6 = vpop.f32.mrf.mxu1  ;;  %v717_v22 = vadd.f32 %v716_v24, %v2139_v12 }
 0x1f7   : > { %v718_v7 = vpop.f32.mrf.mxu0  ;;  %v806_v49 = vadd.f32 %v805_v6, %v2139_v12 }
 0x1f8   : > { %v807_v8 = vpop.f32.mrf.mxu1  ;;  %v719_v16 = vadd.f32 %v718_v7, %v2139_v12  ;;  %1618 = vtanh.f32 %v717_v22 }
 0x1f9   : > { %v722_v9 = vpop.f32.mrf.mxu0  ;;  %v808_v32 = vadd.f32 %v807_v8, %v2139_v12 }
 0x1fa   : > { %v811_v10 = vpop.f32.mrf.mxu1  ;;  %v723_v18 = vadd.f32 %v722_v9, %v2142_v15  ;;  %1620 = vtanh.f32 %v719_v16 }
 0x1fb   : > { %v724_v11 = vpop.f32.mrf.mxu0  ;;  %v812_v46 = vadd.f32 %v811_v10, %v2142_v15 }
 0x1fc   : > { %v813_v13 = vpop.f32.mrf.mxu1  ;;  %v725_v20 = vadd.f32 %v724_v11, %v2142_v15  ;;  %1622 = vtanh.f32 %v723_v18 }
 0x1fd   : > { %v728_v14 = vpop.f32.mrf.mxu0  ;;  %v814_v42 = vadd.f32 %v813_v13, %v2142_v15 }
 0x1fe   : > { %v817_v17 = vpop.f32.mrf.mxu1  ;;  %v729_v28 = vadd.f32 %v728_v14, %v2135_v25  ;;  %1624 = vtanh.f32 %v725_v20 }
 0x1ff   : > { %v730_v19 = vpop.f32.mrf.mxu0  ;;  %v818_v41 = vadd.f32 %v817_v17, %v2135_v25 }
 0x200   : > { %v819_v21 = vpop.f32.mrf.mxu1  ;;  %v731_v29 = vadd.f32 %v730_v19, %v2135_v25  ;;  %1626 = vtanh.f32 %v729_v28 }
 0x201   : > { %v820_v40 = vadd.f32 %v819_v21, %v2135_v25 }
 0x202   : > { %1628 = vtanh.f32 %v731_v29 }
 0x203   : > { %v734_v30 = vpop.f32.mrf.mxu0  ;;  %v823_v31 = vpop.f32.mrf.mxu1 }
 0x204   : > { %v735_v34 = vadd.f32 %v734_v30, %v2137_v23  ;;  %v824_v37 = vadd.f32 %v823_v31, %v2137_v23 }
 0x205   : > { %v736_v35 = vpop.f32.mrf.mxu0  ;;  %v825_v36 = vpop.f32.mrf.mxu1 }
 0x206   : > { %v737_v38 = vadd.f32 %v736_v35, %v2137_v23  ;;  %v826_v39 = vadd.f32 %v825_v36, %v2137_v23  ;;  %1630 = vtanh.f32 %v735_v34  ;;  %v2163_v51 = vpop.eup %1618 }
 0x207   : > { %v1621_v52 = vpop.eup %1620 }
 0x208   : > { %1632 = vtanh.f32 %v737_v38 }
 0x209   : > { %1634 = vtanh.f32 %v826_v39  ;;  %v894_v44 = vpop.f32.mrf.mxu0  ;;  %v2156_v45 = vpop.f32.mrf.mxu1 }
 0x20a   : > { %1636 = vtanh.f32 %v824_v37  ;;  %v895_v53 = vadd.f32 %v894_v44, %v2139_v12  ;;  %v1623_v55 = vpop.eup %1622 }
 0x20b   : > { %1638 = vtanh.f32 %v820_v40  ;;  %v896_v47 = vpop.f32.mrf.mxu0  ;;  %v2160_v48 = vpop.f32.mrf.mxu1 }
 0x20c   : > { %1640 = vtanh.f32 %v818_v41  ;;  %v897_v56 = vadd.f32 %v896_v47, %v2139_v12  ;;  %v1625_v33 = vpop.eup %1624  ;;  %v986_v31 = vadd.f32 %v2160_v48, %v2139_v12  ;;  %v1043_v47 = vpop.permute.xlu0 %1042 }
 0x20d   : > { %1642 = vtanh.f32 %v814_v42  ;;  %v900_v50 = vpop.f32.mrf.mxu0  ;;  %v989_v43 = vpop.f32.mrf.mxu1 }
 0x20e   : > { %1644 = vtanh.f32 %v812_v46  ;;  %v901_v57 = vadd.f32 %v900_v50, %v2142_v15  ;;  %v1627_v60 = vpop.eup %1626  ;;  %v990_v29 = vadd.f32 %v989_v43, %v2142_v15 }
 0x20f   : > { %1646 = vtanh.f32 %v808_v32  ;;  %v902_v27 = vpop.f32.mrf.mxu0  ;;  %v991_v54 = vpop.f32.mrf.mxu1 }
 0x210   : > { %1648 = vtanh.f32 %v806_v49  ;;  %v903_v61 = vadd.f32 %v902_v27, %v2142_v15  ;;  %v1629_v62 = vpop.eup %1628  ;;  %v992_v28 = vadd.f32 %v991_v54, %v2142_v15 }
 0x211   : > { %v906_v58 = vpop.f32.mrf.mxu0  ;;  %v995_v59 = vpop.f32.mrf.mxu1  ;;  %1650 = vtanh.f32 %v895_v53 }
 0x212   : > { %v907_v63 = vadd.f32 %v906_v58, %v2135_v25  ;;  %1652 = vtanh.f32 %v897_v56  ;;  %v996_v20 = vadd.f32 %v995_v59, %v2135_v25 }
 0x213   : > { %v908_v1 = vpop.f32.mrf.mxu0  ;;  %v997_v2 = vpop.f32.mrf.mxu1  ;;  %1654 = vtanh.f32 %v901_v57 }
 0x214   : > { %v1631_v3 = vpop.eup %1630  ;;  %v909_v4 = vadd.f32 %v908_v1, %v2135_v25  ;;  %1656 = vtanh.f32 %v903_v61  ;;  %v998_v18 = vadd.f32 %v997_v2, %v2135_v25  ;;  %v984_v25 = vadd.f32 %v2156_v45, %v2139_v12 }
 0x215   : > { %v1633_v5 = vpop.eup %1632  ;;  %v912_v24 = vpop.f32.mrf.mxu0  ;;  %1658 = vtanh.f32 %v907_v63 }
 0x216   : > { %v1001_v6 = vpop.f32.mrf.mxu1  ;;  %v1635_v7 = vpop.eup %1634  ;;  %v913_v8 = vadd.f32 %v912_v24, %v2137_v23  ;;  %1071 = vmatprep.subr.mxu0 %v1633_v5  ;;  %1660 = vtanh.f32 %v909_v4 }
 0x217   : > { %v1637_v9 = vpop.eup %1636  ;;  %v914_v10 = vpop.f32.mrf.mxu0  ;;  %1142 = vmatprep.subr.mxu1 %v1635_v7  ;;  %1072 = vmatpush1.msra.mxu0 %v1631_v3  ;;  %v1002_v22 = vadd.f32 %v1001_v6, %v2137_v23 }
 0x218   : > { %v1003_v11 = vpop.f32.mrf.mxu1  ;;  %v1639_v13 = vpop.eup %1638  ;;  %v915_v14 = vadd.f32 %v914_v10, %v2137_v23  ;;  %1143 = vmatpush1.msra.mxu1 %v1637_v9  ;;  %1073 = vmatprep.subr.mxu0 %v1629_v62  ;;  %1662 = vtanh.f32 %v913_v8 }
 0x219   : > { %v1004_v16 = vadd.f32 %v1003_v11, %v2137_v23  ;;  %v1641_v17 = vpop.eup %1640  ;;  %1144 = vmatprep.subr.mxu1 %v1639_v13  ;;  %1074 = vmatpush1.msra.mxu0 %v1627_v60 }
 0x21a   : > { %v1643_v19 = vpop.eup %1642  ;;  %1664 = vtanh.f32 %v915_v14  ;;  %1145 = vmatpush1.msra.mxu1 %v1641_v17  ;;  %1075 = vmatprep.subr.mxu0 %v1625_v33 }
 0x21b   : > { %v1645_v21 = vpop.eup %1644  ;;  %1666 = vtanh.f32 %v1004_v16  ;;  %1146 = vmatprep.subr.mxu1 %v1643_v19  ;;  %1076 = vmatpush1.msra.mxu0 %v1623_v55 }
 0x21c   : > { %v1647_v23 = vpop.eup %1646  ;;  %1668 = vtanh.f32 %v1002_v22  ;;  %1147 = vmatpush1.msra.mxu1 %v1645_v21  ;;  %1077 = vmatprep.subr.mxu0 %v1621_v52 }
 0x21d   : > { %v1649_v30 = vpop.eup %1648  ;;  %1670 = vtanh.f32 %v998_v18  ;;  %1148 = vmatprep.subr.mxu1 %v1647_v23  ;;  %1078 = vmatpush1.msra.mxu0 %v2163_v51 }
 0x21e   : > { %1672 = vtanh.f32 %v996_v20  ;;  %1149 = vmatpush1.msra.mxu1 %v1649_v30  ;;  %1477 = vmatmul.mubr.msk.f32.vlgmr.msra.gmra.mxu0 %vm641_vm1, %v2021_v26  ;;  %v1651_v15 = vpop.eup %1650 }
 0x21f   : > { %1674 = vtanh.f32 %v992_v28  ;;  %1478 = vmatmul.mubr.msk.f32.vlgmr.msra.gmra.mxu1 %vm641_vm1, %v2021_v26  ;;  %1253 = vmatprep.mubr.f32.mxu0 %v1813_v0  ;;  %v1653_v34 = vpop.eup %1652 }
 0x220   : > { %1676 = vtanh.f32 %v990_v29  ;;  %1324 = vmatprep.mubr.f32.mxu1 %v1813_v0  ;;  %v1655_v35 = vpop.eup %1654 }
 0x221   : > { %1678 = vtanh.f32 %v986_v31  ;;  %v1657_v12 = vpop.eup %1656 }
 0x222   : > { %1680 = vtanh.f32 %v984_v25  ;;  %v1659_v36 = vpop.eup %1658 }
 0x223   : > { %v1661_v37 = vpop.eup %1660 }
 0x225   : > { %v1663_v38 = vpop.eup %1662 }
 0x227   : > { %v1665_v39 = vpop.eup %1664 }
 0x228   : > { %v1667_v40 = vpop.eup %1666  ;;  %1213 = vmatprep.subr.mxu0 %v1665_v39 }
 0x229   : > { %v1669_v41 = vpop.eup %1668  ;;  %1284 = vmatprep.subr.mxu1 %v1667_v40  ;;  %1214 = vmatpush1.msra.mxu0 %v1663_v38 }
 0x22a   : > { %v1671_v42 = vpop.eup %1670  ;;  %1285 = vmatpush1.msra.mxu1 %v1669_v41  ;;  %1215 = vmatprep.subr.mxu0 %v1661_v37 }
 0x22b   : > { %v1673_v44 = vpop.eup %1672  ;;  %1286 = vmatprep.subr.mxu1 %v1671_v42  ;;  %1216 = vmatpush1.msra.mxu0 %v1659_v36 }
 0x22c   : > { %v1675_v0 = vpop.eup %1674  ;;  %1287 = vmatpush1.msra.mxu1 %v1673_v44  ;;  %1217 = vmatprep.subr.mxu0 %v1657_v12 }
 0x22d   : > { %v1677_v45 = vpop.eup %1676  ;;  %1288 = vmatprep.subr.mxu1 %v1675_v0  ;;  %1218 = vmatpush1.msra.mxu0 %v1655_v35 }
 0x22e   : > { %v1679_v46 = vpop.eup %1678  ;;  %1289 = vmatpush1.msra.mxu1 %v1677_v45  ;;  %1219 = vmatprep.subr.mxu0 %v1653_v34 }
 0x22f   : > { %v1681_v32 = vpop.eup %1680  ;;  %1290 = vmatprep.subr.mxu1 %v1679_v46  ;;  %1220 = vmatpush1.msra.mxu0 %v1651_v15 }
 0x230   : > { %1291 = vmatpush1.msra.mxu1 %v1681_v32  ;;  %1479 = vmatmul.mubr.msk.f32.vlgmr.msra.gmra.mxu0 %vm641_vm1, %v2021_v26 }
 0x231   : > { %1480 = vmatmul.mubr.msk.f32.vlgmr.msra.gmra.mxu1 %vm641_vm1, %v2021_v26 }
 0x2de   : > { %v1113_v48 = vpop.f32.mrf.mxu0 }
 0x2df   : > { %v1114_v49 = vadd.f32 %v1113_v48, %v1043_v47  ;;  %v1184_v50 = vpop.f32.mrf.mxu1 }
 0x2e0   : > { %v1185_v43 = vadd.f32 %v1184_v50, %v1043_v47  ;;  %v1115_v51 = vpop.f32.mrf.mxu0 }
 0x2e1   : > { %1331 = vst [vmem:[%s176_s23] sm:$0xff] %v1114_v49  ;;  %v1116_v52 = vadd.f32 %v1115_v51, %v1043_v47  ;;  %v1186_v53 = vpop.f32.mrf.mxu1 }
 0x2e2   : > { %1333 = vst [vmem:[%s176_s23 + $0x10] sm:$0xff] %v1185_v43  ;;  %v1187_v27 = vadd.f32 %v1186_v53, %v1043_v47 }
 0x2e3   : > { %1332 = vst [vmem:[%s176_s23 + $0x8] sm:$0xff] %v1116_v52 }
 0x2e4   : > { %1334 = vst [vmem:[%s176_s23 + $0x18] sm:$0xff] %v1187_v27 }
 0x2f0   : > { %v1255_v54 = vpop.f32.mrf.mxu0 }
 0x2f1   : > { %v1256_v55 = vadd.f32 %v1255_v54, %v1043_v47  ;;  %v1326_v26 = vpop.f32.mrf.mxu1 }
 0x2f2   : > { %v1327_v56 = vadd.f32 %v1326_v26, %v1043_v47  ;;  %v1257_v33 = vpop.f32.mrf.mxu0 }
 0x2f3   : > { %1335 = vst [vmem:[%s176_s23 + $0x20] sm:$0xff] %v1256_v55  ;;  %v1258_v57 = vadd.f32 %v1257_v33, %v1043_v47  ;;  %v1328_v58 = vpop.f32.mrf.mxu1 }
 0x2f4   : > { %1337 = vst [vmem:[%s176_s23 + $0x30] sm:$0xff] %v1327_v56  ;;  %v1329_v59 = vadd.f32 %v1328_v58, %v1043_v47 }
 0x2f5   : > { %1336 = vst [vmem:[%s176_s23 + $0x28] sm:$0xff] %v1258_v57 }
 0x2f6   : > { %1338 = vst [vmem:[%s176_s23 + $0x38] sm:$0xff] %v1329_v59 }
 0x2f7   : > { %1749 = shalt.err (!%p1746_p10)
}
 0x2f8   : > { %s1750_s7 = scalar_lea.hbm %s2199_s30, 1024  ;;  %s1754_s17 = scalar_lea.hbm %s2238_s2, 2048 }
 0x2f9   : > { %p1751_p5 = scmp.ne.s32.totalorder %s2199_s30, %s1750_s7  ;;  %p1755_p4 = scmp.lt.s32.totalorder %s2199_s30, %s2238_s2 }
 0x2fa   : > { %p1756_p0 = scmp.lt.s32.totalorder %s1754_s17, %s1750_s7 }
 0x2fb   : > { %p1752_p11 = pnand %p1751_p5, %p2254_p13 }
 0x2fc   : > { %p1757_p1 = por %p1756_p0, %p1755_p4 }
 0x2fd   : > { %p1753_p6 = pneg %p1752_p11 }
 0x2ff   : > { %p1758_p12 = pnand %p1757_p1, %p1753_p6 }
 0x301   : > { %1761 = shalt.err (!%p1758_p12)
}
 0x302   : > { %1494 = dma.vmem_to_hbm [thread:$0]  (%p2254_p13), %s1355_s16, 1024, %s2199_s30, %s1340_s3  }
 0x303 PF: > { %s1366_s28 = sand.u32 1, %s1792_s9   ;;  %p2255_p2 = scmp.ne.s32.totalorder %s2246_s22, 0 }
 0x304   : > { %p2256_p3 = scmp.ge.s32.totalorder %s1804_s12, 2  ;;  %s1367_s29 = scalar_lea.sflag [#allocation4], %s1366_s28 }
 0x306   : > { %p1505_p7 = pnand %p2256_p3, %p2255_p2 }
 0x308   : > { %p1506_p8 = pneg %p1505_p7 }
 0x30a   : > { %1787 = dma.done.wait (%p1506_p8), %s1367_s29, 1024  }
 0x30b   : > { %1789 = vsyncadd (%p1506_p8), %s1367_s29, 4294966272  ;;  %p16_p9 = scmp.ge.s32.totalorder %s1856_s15, 4   ;;  %s2257_s9 = smov %s1796_s10 }
 0x30c   : > { %s2258_s10 = smov %s1800_s11  ;;  %s2259_s11 = smov %s1868_s18 }
 0x30d   : > { %s2260_s12 = smov %s1856_s15  ;;  %18 = sbr.rel (!%p16_p9) target bundleno = 6 (0x6), region = 79 }
 0x312   :  { %1372 = vsyncpa [#allocation3], 1 }
 0x313   :  { %1374 = vsyncpa [#allocation3 + $0x1], 1 }
 0x314   :  { %1375 = vsyncpa [#allocation6], 1 }
 0x315   :  { %1376 = vsyncpa [#allocation4], 1 }
 0x316   :  { %1378 = vsyncpa [#allocation4 + $0x1], 1 }

</bundles_post_ra>
